<compile_context>
chip_gen: v7x
topology: tpu7x:2x2x1
jax: 0.10.0
libtpu: 0.0.40
codegen_flags: <defaults>
</compile_context>

<pallas_src>
import functools

import numpy as np
import jax
import jax.numpy as jnp
from jax.experimental import pallas as pl
from jax.experimental.pallas import tpu as pltpu

LANE = 128
_TILE_CAP = 1024          # default max batch-tile rows


def _round_up(x, m):
    return (x + m - 1) // m * m


def mlp_kernel(x_ref, w1_ref, b1_ref, w2_ref, b2_ref, w3_ref, b3_ref, out_ref):
    """relu(relu(x@W1+b1)@W2+b2)@W3+b3 on one (tile_b, f_in) batch tile.

    Weights are (in, out) bf16; biases are (1, out) f32; accumulation is f32.
    x arrives in its HBM dtype and is cast to the compute dtype here (no
    wrapper-side HBM pass over the activations).
    """
    x = x_ref[...].astype(w1_ref.dtype)
    h1 = jnp.dot(x, w1_ref[...], preferred_element_type=jnp.float32)
    h1 = jnp.maximum(h1 + b1_ref[...], 0.0)                       # ReLU
    h2 = jnp.dot(h1.astype(w2_ref.dtype), w2_ref[...],
                 preferred_element_type=jnp.float32)
    h2 = jnp.maximum(h2 + b2_ref[...], 0.0)                       # ReLU
    out = jnp.dot(h2.astype(w3_ref.dtype), w3_ref[...],
                  preferred_element_type=jnp.float32)
    out_ref[...] = (out + b3_ref[...]).astype(out_ref.dtype)


def prepare_params(params, compute_dtype=jnp.bfloat16):
    """One-time prep: transpose to (in, out), pad output dims to 128, cast.

    Call OUTSIDE the training/inference hot loop. W1's contraction (row) dim
    is left at f_in so x needs no feature padding; W2/W3 rows are padded to
    match the previous layer's padded output width. Zero padding is inert
    (ReLU(0)=0, zero rows contribute 0) and padded logit columns are sliced
    off in the wrapper.
    """
    def pad_w(w, pad_rows):  # PyTorch (out, in) -> padded (in[_p], out_p) bf16
        wt = jnp.asarray(w).T
        rp = _round_up(wt.shape[0], LANE) if pad_rows else wt.shape[0]
        cp = _round_up(wt.shape[1], LANE)
        return jnp.pad(wt, ((0, rp - wt.shape[0]),
                            (0, cp - wt.shape[1]))).astype(compute_dtype)

    def pad_b(b):  # (out,) -> (1, out_p) in f32
        b = jnp.asarray(b, jnp.float32)
        cp = _round_up(b.shape[0], LANE)
        return jnp.pad(b, (0, cp - b.shape[0])).reshape(1, cp)

    return {
        "w1": pad_w(params["w1"], pad_rows=False), "b1": pad_b(params["b1"]),
        "w2": pad_w(params["w2"], pad_rows=True),  "b2": pad_b(params["b2"]),
        "w3": pad_w(params["w3"], pad_rows=True),  "b3": pad_b(params["b3"]),
    }


@functools.partial(jax.jit,
                   static_argnames=("num_classes", "tile_b", "out_dtype"))
def meta_continual_learning_mlp_forward(x_nchw, weights, *, num_classes,
                                        tile_b=None, out_dtype=jnp.bfloat16):
    """Forward pass. `weights` is the output of prepare_params()."""
    w1, b1 = weights["w1"], weights["b1"]
    w2, b2 = weights["w2"], weights["b2"]
    w3, b3 = weights["w3"], weights["b3"]

    B = x_nchw.shape[0]
    f_in = int(np.prod(x_nchw.shape[1:]))
    assert f_in == w1.shape[0], "input feature size does not match W1"
    h0_pad = w1.shape[1]
    h1_pad = w2.shape[1]
    nc_pad = w3.shape[1]

    # Sublane packing: bf16 activations pack 16 rows/vreg, f32 pack 8.
    sub = 16 if x_nchw.dtype == jnp.bfloat16 else 8

    x2d = x_nchw.reshape(B, f_in)          # nn.Flatten (row-major view)
    b8 = _round_up(max(B, sub), sub)

    if tile_b is None:
        if b8 <= _TILE_CAP:
            # Prefer >=2 grid steps (v7x megacore) when splitting adds no pad.
            half = b8 // 2
            tile_b = half if (b8 >= 2 * sub and half % sub == 0) else b8
        else:
            # Largest tile (amortizes ~0.35us/step) with <=12.5% pad waste.
            tile_b = sub
            for cand in (_TILE_CAP, 512, 256, 128, 64, 32, 16, sub):
                if cand % sub == 0 and _round_up(b8, cand) - b8 <= b8 // 8:
                    tile_b = cand
                    break
    else:
        tile_b = max(sub, _round_up(int(tile_b), sub))
        tile_b = min(tile_b, b8)
    b_pad = _round_up(b8, tile_b)

    if b_pad != B:
        # Pad batch rows only (inert, sliced off); no feature pad, no cast.
        x2d = jnp.pad(x2d, ((0, b_pad - B), (0, 0)))

    grid = (b_pad // tile_b,)

    weight_bytes = sum(int(a.size) * a.dtype.itemsize
                       for a in (w1, b1, w2, b2, w3, b3))
    out_itemsize = jnp.dtype(out_dtype).itemsize
    cost = pl.CostEstimate(
        flops=2 * b_pad * (f_in * h0_pad + h0_pad * h1_pad + h1_pad * nc_pad),
        transcendentals=0,
        bytes_accessed=(int(x2d.size) * x2d.dtype.itemsize + weight_bytes
                        + b_pad * nc_pad * out_itemsize),
    )
    # Tile footprint: double-buffered x/out tiles, resident weights (counted
    # twice to be safe), f32 intermediates; plus headroom. Floor at the common
    # 32 MiB scoped default so small shapes are unaffected.
    vmem_est = (2 * tile_b * f_in * x2d.dtype.itemsize
                + 2 * weight_bytes
                + 2 * tile_b * nc_pad * out_itemsize
                + tile_b * (h0_pad + h1_pad) * 4)
    vmem_limit = int(max(32 << 20, min(100 << 20, vmem_est + (8 << 20))))

    out = pl.pallas_call(
        mlp_kernel,
        out_shape=jax.ShapeDtypeStruct((b_pad, nc_pad), out_dtype),
        grid=grid,
        in_specs=[
            pl.BlockSpec((tile_b, f_in), lambda i: (i, 0)),     # x: tiled over batch
            pl.BlockSpec((f_in, h0_pad), lambda i: (0, 0)),     # W1 resident
            pl.BlockSpec((1, h0_pad), lambda i: (0, 0)),        # b1 resident
            pl.BlockSpec((h0_pad, h1_pad), lambda i: (0, 0)),   # W2 resident
            pl.BlockSpec((1, h1_pad), lambda i: (0, 0)),        # b2 resident
            pl.BlockSpec((h1_pad, nc_pad), lambda i: (0, 0)),   # W3 resident
            pl.BlockSpec((1, nc_pad), lambda i: (0, 0)),        # b3 resident
        ],
        out_specs=pl.BlockSpec((tile_b, nc_pad), lambda i: (i, 0)),
        compiler_params=pltpu.CompilerParams(
            dimension_semantics=("parallel",),
            vmem_limit_bytes=vmem_limit),
        cost_estimate=cost,
    )(x2d, w1, b1, w2, b2, w3, b3)

    # Drop padded batch rows and padded class columns (exact zeros, not logits).
    return out[:B, :num_classes]


def init_params(key, input_size, num_classes, hidden_sizes=(100, 100)):
    """Deterministic init mimicking nn.Linear default (uniform +/- 1/sqrt(fan_in))."""
    in_feats = int(np.prod(input_size))
    dims = [in_feats, *hidden_sizes, num_classes]
    params = {}
    for i, (fan_in, fan_out) in enumerate(zip(dims[:-1], dims[1:]), start=1):
        key, kw, kb = jax.random.split(key, 3)
        bound = 1.0 / np.sqrt(fan_in)
        params[f"w{i}"] = jax.random.uniform(
            kw, (fan_out, fan_in), jnp.float32, -bound, bound)   # PyTorch (out, in)
        params[f"b{i}"] = jax.random.uniform(
            kb, (fan_out,), jnp.float32, -bound, bound)
    return params


def _reference(x, params):
    xf = x.reshape(x.shape[0], -1)
    h = jnp.maximum(xf @ params["w1"].T + params["b1"], 0.0)
    h = jnp.maximum(h @ params["w2"].T + params["b2"], 0.0)
    return h @ params["w3"].T + params["b3"]


if __name__ == "__main__":
    key = jax.random.PRNGKey(0)

    input_size = (4, 16, 16)     # C, H, W
    num_classes = 10
    hidden_sizes = (100, 100)

    params = init_params(key, input_size, num_classes, hidden_sizes)
    weights = prepare_params(params)                 # one-time, outside hot loop
    weights = jax.tree_util.tree_map(jax.block_until_ready, weights)

    # Test 1: tiny batch (single grid step).
    key, kx = jax.random.split(key)
    x_small = jax.random.normal(kx, (2, *input_size), jnp.float32)   # NCHW
    out_small = meta_continual_learning_mlp_forward(
        x_small, weights, num_classes=num_classes)
    out_small = jax.block_until_ready(out_small)
    ref_small = _reference(x_small, params)
    assert out_small.shape == (2, num_classes)
    np.testing.assert_allclose(np.asarray(out_small, np.float32),
                               np.asarray(ref_small), rtol=5e-2, atol=5e-2)

    # Test 2: batch that splits into 2 grid steps (exercises multi-tile path /
    # v7x dual-TensorCore sharding of the "parallel" axis).
    key, kx = jax.random.split(key)
    x_big = jax.random.normal(kx, (32, *input_size), jnp.float32)
    out_big = meta_continual_learning_mlp_forward(
        x_big, weights, num_classes=num_classes)
    out_big = jax.block_until_ready(out_big)
    ref_big = _reference(x_big, params)
    assert out_big.shape == (32, num_classes)
    np.testing.assert_allclose(np.asarray(out_big, np.float32),
                               np.asarray(ref_big), rtol=5e-2, atol=5e-2)

    print("KERNEL_OK")
</pallas_src>

<mosaic_0001>
module attributes {stable_mosaic.version = 11 : i64} {
  func.func @mlp_kernel(%arg0: i32, %arg1: memref<8x1024xf32, #tpu.memory_space<vmem>>, %arg2: memref<1024x128xbf16, #tpu.memory_space<vmem>>, %arg3: memref<1x128xf32, #tpu.memory_space<vmem>>, %arg4: memref<128x128xbf16, #tpu.memory_space<vmem>>, %arg5: memref<1x128xf32, #tpu.memory_space<vmem>>, %arg6: memref<128x128xbf16, #tpu.memory_space<vmem>>, %arg7: memref<1x128xf32, #tpu.memory_space<vmem>>, %arg8: memref<8x128xbf16, #tpu.memory_space<vmem>>) attributes {dimension_semantics = [#tpu.dimension_semantics<parallel>], iteration_bounds = array<i64: 1>, scalar_prefetch = 0 : i64, scratch_operands = 0 : i64, tpu.core_type = #tpu.core_type<tc>, window_params = [{transform_indices = @transform_0, window_bounds = array<i64: 8, 1024>}, {pipeline_mode = #tpu.pipeline_mode<synchronous>, transform_indices = @transform_1, window_bounds = array<i64: 1024, 128>}, {pipeline_mode = #tpu.pipeline_mode<synchronous>, transform_indices = @transform_2, window_bounds = array<i64: 1, 128>}, {pipeline_mode = #tpu.pipeline_mode<synchronous>, transform_indices = @transform_3, window_bounds = array<i64: 128, 128>}, {pipeline_mode = #tpu.pipeline_mode<synchronous>, transform_indices = @transform_4, window_bounds = array<i64: 1, 128>}, {pipeline_mode = #tpu.pipeline_mode<synchronous>, transform_indices = @transform_5, window_bounds = array<i64: 128, 128>}, {pipeline_mode = #tpu.pipeline_mode<synchronous>, transform_indices = @transform_6, window_bounds = array<i64: 1, 128>}, {transform_indices = @transform_7, window_bounds = array<i64: 8, 128>}]} {
    %c0 = arith.constant 0 : index
    %c0_0 = arith.constant 0 : index
    %0 = vector.load %arg1[%c0, %c0_0] : memref<8x1024xf32, #tpu.memory_space<vmem>>, vector<8x1024xf32>
    %1 = arith.truncf %0 : vector<8x1024xf32> to vector<8x1024xbf16>
    %c0_1 = arith.constant 0 : index
    %c0_2 = arith.constant 0 : index
    %2 = vector.load %arg2[%c0_1, %c0_2] : memref<1024x128xbf16, #tpu.memory_space<vmem>>, vector<1024x128xbf16>
    %cst = arith.constant dense<0.000000e+00> : vector<8x128xf32>
    %3 = tpu.matmul %1, %2, %cst {dimension_numbers = #tpu.dot_dimension_numbers<[1], [0], [0], [1], [0, 0, 1, 1], [], []>} : vector<8x1024xbf16>, vector<1024x128xbf16>, vector<8x128xf32> -> vector<8x128xf32>
    %c0_3 = arith.constant 0 : index
    %c0_4 = arith.constant 0 : index
    %4 = vector.load %arg3[%c0_3, %c0_4] : memref<1x128xf32, #tpu.memory_space<vmem>>, vector<1x128xf32>
    %5 = vector.broadcast %4 : vector<1x128xf32> to vector<8x128xf32>
    %6 = arith.addf %3, %5 : vector<8x128xf32>
    %cst_5 = arith.constant 0.000000e+00 : f32
    %7 = vector.broadcast %cst_5 : f32 to vector<8x128xf32>
    %8 = arith.maximumf %6, %7 : vector<8x128xf32>
    %9 = arith.truncf %8 : vector<8x128xf32> to vector<8x128xbf16>
    %c0_6 = arith.constant 0 : index
    %c0_7 = arith.constant 0 : index
    %10 = vector.load %arg4[%c0_6, %c0_7] : memref<128x128xbf16, #tpu.memory_space<vmem>>, vector<128x128xbf16>
    %cst_8 = arith.constant dense<0.000000e+00> : vector<8x128xf32>
    %11 = tpu.matmul %9, %10, %cst_8 {dimension_numbers = #tpu.dot_dimension_numbers<[1], [0], [0], [1], [0, 0, 1, 1], [], []>} : vector<8x128xbf16>, vector<128x128xbf16>, vector<8x128xf32> -> vector<8x128xf32>
    %c0_9 = arith.constant 0 : index
    %c0_10 = arith.constant 0 : index
    %12 = vector.load %arg5[%c0_9, %c0_10] : memref<1x128xf32, #tpu.memory_space<vmem>>, vector<1x128xf32>
    %13 = vector.broadcast %12 : vector<1x128xf32> to vector<8x128xf32>
    %14 = arith.addf %11, %13 : vector<8x128xf32>
    %cst_11 = arith.constant 0.000000e+00 : f32
    %15 = vector.broadcast %cst_11 : f32 to vector<8x128xf32>
    %16 = arith.maximumf %14, %15 : vector<8x128xf32>
    %17 = arith.truncf %16 : vector<8x128xf32> to vector<8x128xbf16>
    %c0_12 = arith.constant 0 : index
    %c0_13 = arith.constant 0 : index
    %18 = vector.load %arg6[%c0_12, %c0_13] : memref<128x128xbf16, #tpu.memory_space<vmem>>, vector<128x128xbf16>
    %cst_14 = arith.constant dense<0.000000e+00> : vector<8x128xf32>
    %19 = tpu.matmul %17, %18, %cst_14 {dimension_numbers = #tpu.dot_dimension_numbers<[1], [0], [0], [1], [0, 0, 1, 1], [], []>} : vector<8x128xbf16>, vector<128x128xbf16>, vector<8x128xf32> -> vector<8x128xf32>
    %c0_15 = arith.constant 0 : index
    %c0_16 = arith.constant 0 : index
    %20 = vector.load %arg7[%c0_15, %c0_16] : memref<1x128xf32, #tpu.memory_space<vmem>>, vector<1x128xf32>
    %21 = vector.broadcast %20 : vector<1x128xf32> to vector<8x128xf32>
    %22 = arith.addf %19, %21 : vector<8x128xf32>
    %23 = arith.truncf %22 : vector<8x128xf32> to vector<8x128xbf16>
    %c0_17 = arith.constant 0 : index
    %c0_18 = arith.constant 0 : index
    %24 = vector.load %arg8[%c0_17, %c0_18] : memref<8x128xbf16, #tpu.memory_space<vmem>>, vector<8x128xbf16>
    tpu.vector_store %arg8[%c0_17, %c0_18], %23 {strides = array<i32>} : memref<8x128xbf16, #tpu.memory_space<vmem>>, vector<8x128xbf16>,
    return
  }
  func.func @transform_0(%arg0: i32) -> (i32, i32) {
    %c0_i32 = arith.constant 0 : i32
    %c0_i32_0 = arith.constant 0 : i32
    return %arg0, %c0_i32 : i32, i32
  }
  func.func @transform_1(%arg0: i32) -> (i32, i32) {
    %c0_i32 = arith.constant 0 : i32
    %c0_i32_0 = arith.constant 0 : i32
    %c0_i32_1 = arith.constant 0 : i32
    return %c0_i32, %c0_i32_0 : i32, i32
  }
  func.func @transform_2(%arg0: i32) -> (i32, i32) {
    %c0_i32 = arith.constant 0 : i32
    %c0_i32_0 = arith.constant 0 : i32
    %c0_i32_1 = arith.constant 0 : i32
    return %c0_i32, %c0_i32_0 : i32, i32
  }
  func.func @transform_3(%arg0: i32) -> (i32, i32) {
    %c0_i32 = arith.constant 0 : i32
    %c0_i32_0 = arith.constant 0 : i32
    %c0_i32_1 = arith.constant 0 : i32
    return %c0_i32, %c0_i32_0 : i32, i32
  }
  func.func @transform_4(%arg0: i32) -> (i32, i32) {
    %c0_i32 = arith.constant 0 : i32
    %c0_i32_0 = arith.constant 0 : i32
    %c0_i32_1 = arith.constant 0 : i32
    return %c0_i32, %c0_i32_0 : i32, i32
  }
  func.func @transform_5(%arg0: i32) -> (i32, i32) {
    %c0_i32 = arith.constant 0 : i32
    %c0_i32_0 = arith.constant 0 : i32
    %c0_i32_1 = arith.constant 0 : i32
    return %c0_i32, %c0_i32_0 : i32, i32
  }
  func.func @transform_6(%arg0: i32) -> (i32, i32) {
    %c0_i32 = arith.constant 0 : i32
    %c0_i32_0 = arith.constant 0 : i32
    %c0_i32_1 = arith.constant 0 : i32
    return %c0_i32, %c0_i32_0 : i32, i32
  }
  func.func @transform_7(%arg0: i32) -> (i32, i32) {
    %c0_i32 = arith.constant 0 : i32
    %c0_i32_0 = arith.constant 0 : i32
    return %arg0, %c0_i32 : i32, i32
  }
}

</mosaic_0001>

<bundles_post_ra>
// kernel: meta_continual_learning_mlp_forward.1
= control target key start
LH: loop header
LB: loop body
LE: loop exit
PB: predicated region body
PF: predicated region fallthrough
CT: control target
= control target key end

     0   :  { %12 = vsyncpa [#allocation3], 0  ;;  %s1307_s24 = smov [#allocation2]   ;;  %s1466_s0 = inlined_call_operand.vmem [shape: f32[8,1024], index: 0, kind: input, shape index: {}]   ;;  %s1467_s1 = inlined_call_operand.hbm [shape: bf16[1024,128], index: 1, kind: input, shape index: {}]   ;;  %s1468_s2 = inlined_call_operand.vmem [shape: f32[1,128], index: 2, kind: input, shape index: {}]   ;;  %s1469_s3 = inlined_call_operand.vmem [shape: bf16[128,128], index: 3, kind: input, shape index: {}]   ;;  %s1470_s4 = inlined_call_operand.vmem [shape: f32[1,128], index: 4, kind: input, shape index: {}]   ;;  %s1471_s5 = inlined_call_operand.vmem [shape: bf16[128,128], index: 5, kind: input, shape index: {}]   ;;  %s1472_s6 = inlined_call_operand.vmem [shape: f32[1,128], index: 6, kind: input, shape index: {}]   ;;  %s1473_s7 = inlined_call_operand.vmem [shape: bf16[8,128], index: 7, kind: output, shape index: {}]  }
   0x1   :  { %s20_s25 = sshll.u32 %s1307_s24, 4  ;;  %s1283_s28 = scalar_lea.hbm %s1467_s1, 8192  ;;  %s21_s25 = int_to_ptr.vmem [resolvable:$true] %s20_s25 }
   0x2   :  { %p1284_p0 = scmp.ne.s32.totalorder %s1467_s1, %s1283_s28  ;;  %p1287_p1 = scmp.lt.u32.totalorder %s1283_s28, %s1467_s1 }
   0x4   :  { %p1289_p2 = pnand %p1287_p1, %p1284_p0 }
   0x6   :  { %1292 = shalt.err (!%p1289_p2)
}
   0x7   :  { %s1293_s10 = scalar_lea.vmem %s21_s25, 8192  ;;  %p1298_p4 = scmp.lt.s32.totalorder %s21_s25, %s21_s25 }
   0x8   :  { %p1294_p3 = scmp.ne.s32.totalorder %s21_s25, %s1293_s10  ;;  %p1299_p5 = scmp.lt.s32.totalorder %s1293_s10, %s1293_s10 }
   0xa   :  { %p1300_p6 = por %p1299_p5, %p1298_p4 }
   0xc   :  { %p1301_p7 = pnand %p1300_p6, %p1294_p3 }
   0xe   :  { %1304 = shalt.err (!%p1301_p7)
}
   0xf   :  { %s1308_s11 = smov 64   ;;  %s1309_s12 = smov 4  }
  0x10   :  { %26 = dma.hbm_to_vmem [thread:$0]  %s1467_s1, 8192, %s21_s25, [#allocation3], %s1308_s11, %s1308_s11, %s1309_s12  }
  0x11   :  { %1305 = dma.done.wait [#allocation3], 8192  }
  0x12   :  { %1306 = vsyncadd [#allocation3], 4294959104  ;;  %v1203_v0 = vld [vmem:[#allocation2 + $0x40] sm:$0xff]   ;;  %v1207_v4 = vld [vmem:[#allocation2 + $0x48] sm:$0xff]   ;;  %vm1311_vm0 = vmmov 0  }
  0x13   :  { %v1204_v1 = vld [vmem:[#allocation2 + $0xc0] sm:$0xff]   ;;  %1052 = vmatprep.subr.bf16.mxu0 %v1203_v0  ;;  %v1208_v5 = vld [vmem:[#allocation2 + $0xc8] sm:$0xff]   ;;  %v1211_v8 = vld [vmem:[#allocation2 + $0x50] sm:$0xff]  }
  0x14   :  { %v1205_v2 = vld [vmem:[#allocation2] sm:$0xff]   ;;  %1074 = vmatprep.subr.bf16.mxu1 %v1204_v1  ;;  %v1209_v6 = vld [vmem:[#allocation2 + $0x8] sm:$0xff]   ;;  %v1212_v9 = vld [vmem:[#allocation2 + $0xd0] sm:$0xff]  }
  0x15   :  { %v1206_v3 = vld [vmem:[#allocation2 + $0x80] sm:$0xff]   ;;  %1053 = vmatpush3.bf16.msra.mxu0 %v1205_v2  ;;  %v1210_v7 = vld [vmem:[#allocation2 + $0x88] sm:$0xff]   ;;  %v1213_v10 = vld [vmem:[#allocation2 + $0x10] sm:$0xff]  }
  0x16   :  { %1075 = vmatpush3.bf16.msra.mxu1 %v1206_v3  ;;  %1054 = vmatprep.subr.bf16.mxu0 %v1207_v4  ;;  %v1214_v11 = vld [vmem:[#allocation2 + $0x90] sm:$0xff]   ;;  %v1215_v12 = vld [vmem:[#allocation2 + $0x58] sm:$0xff]   ;;  %v1219_v16 = vld [vmem:[#allocation2 + $0x60] sm:$0xff]  }
  0x17   :  { %1076 = vmatprep.subr.bf16.mxu1 %v1208_v5  ;;  %v1216_v13 = vld [vmem:[#allocation2 + $0xd8] sm:$0xff]   ;;  %v1220_v17 = vld [vmem:[#allocation2 + $0xe0] sm:$0xff]   ;;  %v1223_v20 = vld [vmem:[#allocation2 + $0x68] sm:$0xff]  }
  0x18   :  { %v1217_v14 = vld [vmem:[#allocation2 + $0x18] sm:$0xff]   ;;  %v1221_v18 = vld [vmem:[#allocation2 + $0x20] sm:$0xff]   ;;  %v1224_v21 = vld [vmem:[#allocation2 + $0xe8] sm:$0xff]  }
  0x19   :  { %1055 = vmatpush3.bf16.msra.mxu0 %v1209_v6  ;;  %v1218_v15 = vld [vmem:[#allocation2 + $0x98] sm:$0xff]   ;;  %v1222_v19 = vld [vmem:[#allocation2 + $0xa0] sm:$0xff]   ;;  %v1225_v22 = vld [vmem:[#allocation2 + $0x28] sm:$0xff]  }
  0x1a   :  { %1077 = vmatpush3.bf16.msra.mxu1 %v1210_v7  ;;  %1056 = vmatprep.subr.bf16.mxu0 %v1211_v8  ;;  %v1226_v23 = vld [vmem:[#allocation2 + $0xa8] sm:$0xff]   ;;  %v1227_v24 = vld [vmem:[#allocation2 + $0x70] sm:$0xff]   ;;  %v1231_v28 = vld [vmem:[#allocation2 + $0x78] sm:$0xff]  }
  0x1b   :  { %1078 = vmatprep.subr.bf16.mxu1 %v1212_v9  ;;  %v1228_v25 = vld [vmem:[#allocation2 + $0xf0] sm:$0xff]   ;;  %v1232_v29 = vld [vmem:[#allocation2 + $0xf8] sm:$0xff]   ;;  %v42_v32 = vld [vmem:[%s1466_s0 + $0x8] sm:$0xff] }
  0x1c   :  { %v1229_v26 = vld [vmem:[#allocation2 + $0x30] sm:$0xff]   ;;  %v1233_v30 = vld [vmem:[#allocation2 + $0x38] sm:$0xff]   ;;  %v41_v34 = vld [vmem:[%s1466_s0] sm:$0xff]  ;;  %v50_v35 = vpack.c.bf16 %v42_v32, %v42_v32 }
  0x1d   :  { %1057 = vmatpush3.bf16.msra.mxu0 %v1213_v10  ;;  %v1230_v27 = vld [vmem:[#allocation2 + $0xb0] sm:$0xff]   ;;  %v1234_v31 = vld [vmem:[#allocation2 + $0xb8] sm:$0xff]   ;;  %v49_v37 = vpack.c.bf16 %v41_v34, %v41_v34  ;;  %v1235_v40 = vld [vmem:[#allocation2 + $0x140] sm:$0xff]  }
  0x1e   :  { %1079 = vmatpush3.bf16.msra.mxu1 %v1214_v11  ;;  %1058 = vmatprep.subr.bf16.mxu0 %v1215_v12  ;;  %v44_v33 = vld [vmem:[%s1466_s0 + $0x18] sm:$0xff]  ;;  %v43_v38 = vld [vmem:[%s1466_s0 + $0x10] sm:$0xff]  ;;  %v1236_v41 = vld [vmem:[#allocation2 + $0x1c0] sm:$0xff]  }
  0x1f   :  { %1080 = vmatprep.subr.bf16.mxu1 %v1216_v13  ;;  %v52_v36 = vpack.c.bf16 %v44_v33, %v44_v33  ;;  %v51_v39 = vpack.c.bf16 %v43_v38, %v43_v38  ;;  %608 = vmatprep.mubr.bf16.mxu0 %v50_v35  ;;  %v1237_v42 = vld [vmem:[#allocation2 + $0x100] sm:$0xff]   ;;  %v1239_v44 = vld [vmem:[#allocation2 + $0x148] sm:$0xff]   ;;  %v1243_v48 = vld [vmem:[#allocation2 + $0x150] sm:$0xff]  }
  0x20   :  { %v1238_v43 = vld [vmem:[#allocation2 + $0x180] sm:$0xff]   ;;  %v1240_v45 = vld [vmem:[#allocation2 + $0x1c8] sm:$0xff]   ;;  %v1244_v49 = vld [vmem:[#allocation2 + $0x1d0] sm:$0xff]  }
  0x21   :  { %1059 = vmatpush3.bf16.msra.mxu0 %v1217_v14  ;;  %648 = vmatprep.mubr.bf16.mxu1 %v52_v36  ;;  %v1241_v46 = vld [vmem:[#allocation2 + $0x108] sm:$0xff]   ;;  %v1245_v50 = vld [vmem:[#allocation2 + $0x110] sm:$0xff]   ;;  %v1247_v52 = vld [vmem:[#allocation2 + $0x158] sm:$0xff]  }
  0x22   :  { %1081 = vmatpush3.bf16.msra.mxu1 %v1218_v15  ;;  %1060 = vmatprep.subr.bf16.mxu0 %v1219_v16  ;;  %v1242_v47 = vld [vmem:[#allocation2 + $0x188] sm:$0xff]   ;;  %v1246_v51 = vld [vmem:[#allocation2 + $0x190] sm:$0xff]   ;;  %v1248_v53 = vld [vmem:[#allocation2 + $0x1d8] sm:$0xff]  }
  0x23   :  { %1082 = vmatprep.subr.bf16.mxu1 %v1220_v17  ;;  %v1249_v54 = vld [vmem:[#allocation2 + $0x118] sm:$0xff]   ;;  %v1251_v56 = vld [vmem:[#allocation2 + $0x160] sm:$0xff]   ;;  %v1255_v60 = vld [vmem:[#allocation2 + $0x168] sm:$0xff]   ;;  %v1310_v17 = vmov 0.0  }
  0x24   :  { %v1250_v55 = vld [vmem:[#allocation2 + $0x198] sm:$0xff]   ;;  %v1252_v57 = vld [vmem:[#allocation2 + $0x1e0] sm:$0xff]   ;;  %v1256_v61 = vld [vmem:[#allocation2 + $0x1e8] sm:$0xff]  }
  0x25   :  { %1061 = vmatpush3.bf16.msra.mxu0 %v1221_v18  ;;  %v1253_v58 = vld [vmem:[#allocation2 + $0x120] sm:$0xff]   ;;  %v1257_v62 = vld [vmem:[#allocation2 + $0x128] sm:$0xff]   ;;  %v1259_v0 = vld [vmem:[#allocation2 + $0x170] sm:$0xff]  }
  0x26   :  { %1083 = vmatpush3.bf16.msra.mxu1 %v1222_v19  ;;  %1062 = vmatprep.subr.bf16.mxu0 %v1223_v20  ;;  %v1254_v59 = vld [vmem:[#allocation2 + $0x1a0] sm:$0xff]   ;;  %v1258_v63 = vld [vmem:[#allocation2 + $0x1a8] sm:$0xff]   ;;  %v1260_v1 = vld [vmem:[#allocation2 + $0x1f0] sm:$0xff]  }
  0x27   :  { %1084 = vmatprep.subr.bf16.mxu1 %v1224_v21  ;;  %v1261_v2 = vld [vmem:[#allocation2 + $0x130] sm:$0xff]   ;;  %v1263_v4 = vld [vmem:[#allocation2 + $0x178] sm:$0xff]   ;;  %v46_v8 = vld [vmem:[%s1466_s0 + $0x28] sm:$0xff] }
  0x28   :  { %v1262_v3 = vld [vmem:[#allocation2 + $0x1b0] sm:$0xff]   ;;  %v1264_v5 = vld [vmem:[#allocation2 + $0x1f8] sm:$0xff]   ;;  %v54_v10 = vpack.c.bf16 %v46_v8, %v46_v8  ;;  %v45_v12 = vld [vmem:[%s1466_s0 + $0x20] sm:$0xff] }
  0x29   :  { %1063 = vmatpush3.bf16.msra.mxu0 %v1225_v22  ;;  %v1265_v6 = vld [vmem:[#allocation2 + $0x138] sm:$0xff]   ;;  %v47_v13 = vld [vmem:[%s1466_s0 + $0x30] sm:$0xff]  ;;  %v53_v14 = vpack.c.bf16 %v45_v12, %v45_v12  ;;  %v1267_v16 = vld [vmem:[%s1469_s3] sm:$0xff]  }
  0x2a   :  { %1085 = vmatpush3.bf16.msra.mxu1 %v1226_v23  ;;  %1064 = vmatprep.subr.bf16.mxu0 %v1227_v24  ;;  %v1266_v7 = vld [vmem:[#allocation2 + $0x1b8] sm:$0xff]   ;;  %v55_v15 = vpack.c.bf16 %v47_v13, %v47_v13  ;;  %v1268_v18 = vld [vmem:[%s1469_s3 + $0x8] sm:$0xff]   ;;  %v1269_v19 = vld [vmem:[%s1469_s3 + $0x10] sm:$0xff]  }
  0x2b   :  { %1086 = vmatprep.subr.bf16.mxu1 %v1228_v25  ;;  %v48_v9 = vld [vmem:[%s1466_s0 + $0x38] sm:$0xff]  ;;  %v1271_v21 = vld [vmem:[%s1469_s3 + $0x20] sm:$0xff]   ;;  %v1272_v22 = vld [vmem:[%s1469_s3 + $0x28] sm:$0xff]  }
  0x2c   :  { %v56_v11 = vpack.c.bf16 %v48_v9, %v48_v9  ;;  %v1270_v20 = vld [vmem:[%s1469_s3 + $0x18] sm:$0xff]   ;;  %v1273_v23 = vld [vmem:[%s1469_s3 + $0x30] sm:$0xff]   ;;  %v1275_v25 = vld [vmem:[%s1471_s5] sm:$0xff]  }
  0x2d   :  { %1065 = vmatpush3.bf16.msra.mxu0 %v1229_v26  ;;  %v1274_v24 = vld [vmem:[%s1469_s3 + $0x38] sm:$0xff]   ;;  %v1276_v26 = vld [vmem:[%s1471_s5 + $0x8] sm:$0xff]   ;;  %v969_v33 = vld [vmem:[%s1468_s2] ss:$0 sm:$0xff] }
  0x2e   :  { %1087 = vmatpush3.bf16.msra.mxu1 %v1230_v27  ;;  %1066 = vmatprep.subr.bf16.mxu0 %v1231_v28  ;;  %v1277_v27 = vld [vmem:[%s1471_s5 + $0x10] sm:$0xff]   ;;  %v1278_v28 = vld [vmem:[%s1471_s5 + $0x18] sm:$0xff]  }
  0x2f   :  { %1088 = vmatprep.subr.bf16.mxu1 %v1232_v29  ;;  %v1279_v29 = vld [vmem:[%s1471_s5 + $0x20] sm:$0xff]  }
  0x31   :  { %1067 = vmatpush3.bf16.msra.mxu0 %v1233_v30  ;;  %v1280_v30 = vld [vmem:[%s1471_s5 + $0x28] sm:$0xff]  }
  0x32   :  { %1089 = vmatpush3.bf16.msra.mxu1 %v1234_v31  ;;  %1096 = vmatprep.subr.bf16.mxu0 %v1235_v40 }
  0x33   :  { %1118 = vmatprep.subr.bf16.mxu1 %v1236_v41 }
  0x34   :  { %609 = vmatmul.mubr.bf16.vlgmr.msra.gmra.mrb[0].mxu0 %v49_v37 }
  0x35   :  { %649 = vmatmul.mubr.bf16.vlgmr.msra.gmra.mrb[0].mxu1 %v51_v39  ;;  %1097 = vmatpush3.bf16.msra.mxu0 %v1237_v42 }
  0x36   :  { %1119 = vmatpush3.bf16.msra.mxu1 %v1238_v43  ;;  %1098 = vmatprep.subr.bf16.mxu0 %v1239_v44 }
  0x37   :  { %1120 = vmatprep.subr.bf16.mxu1 %v1240_v45  ;;  %688 = vmatprep.mubr.bf16.mxu0 %v54_v10 }
  0x38   :  { %728 = vmatprep.mubr.bf16.mxu1 %v56_v11 }
  0x39   :  { %1099 = vmatpush3.bf16.msra.mxu0 %v1241_v46 }
  0x3a   :  { %1121 = vmatpush3.bf16.msra.mxu1 %v1242_v47  ;;  %1100 = vmatprep.subr.bf16.mxu0 %v1243_v48 }
  0x3b   :  { %1122 = vmatprep.subr.bf16.mxu1 %v1244_v49 }
  0x3d   :  { %1101 = vmatpush3.bf16.msra.mxu0 %v1245_v50 }
  0x3e   :  { %1123 = vmatpush3.bf16.msra.mxu1 %v1246_v51  ;;  %1102 = vmatprep.subr.bf16.mxu0 %v1247_v52 }
  0x3f   :  { %1124 = vmatprep.subr.bf16.mxu1 %v1248_v53 }
  0x41   :  { %1103 = vmatpush3.bf16.msra.mxu0 %v1249_v54 }
  0x42   :  { %1125 = vmatpush3.bf16.msra.mxu1 %v1250_v55  ;;  %1104 = vmatprep.subr.bf16.mxu0 %v1251_v56 }
  0x43   :  { %1126 = vmatprep.subr.bf16.mxu1 %v1252_v57 }
  0x45   :  { %1105 = vmatpush3.bf16.msra.mxu0 %v1253_v58  ;;  %v1281_v58 = vld [vmem:[%s1471_s5 + $0x30] sm:$0xff]  }
  0x46   :  { %1127 = vmatpush3.bf16.msra.mxu1 %v1254_v59  ;;  %1106 = vmatprep.subr.bf16.mxu0 %v1255_v60  ;;  %v1282_v59 = vld [vmem:[%s1471_s5 + $0x38] sm:$0xff]   ;;  %v1034_v60 = vld [vmem:[%s1470_s4] ss:$0 sm:$0xff] }
  0x47   :  { %1128 = vmatprep.subr.bf16.mxu1 %v1256_v61 }
  0x49   :  { %1107 = vmatpush3.bf16.msra.mxu0 %v1257_v62 }
  0x4a   :  { %1129 = vmatpush3.bf16.msra.mxu1 %v1258_v63  ;;  %1108 = vmatprep.subr.bf16.mxu0 %v1259_v0 }
  0x4b   :  { %1130 = vmatprep.subr.bf16.mxu1 %v1260_v1 }
  0x4d   :  { %1109 = vmatpush3.bf16.msra.mxu0 %v1261_v2 }
  0x4e   :  { %1131 = vmatpush3.bf16.msra.mxu1 %v1262_v3  ;;  %1110 = vmatprep.subr.bf16.mxu0 %v1263_v4  ;;  %v1043_v4 = vld [vmem:[%s1472_s6] ss:$0 sm:$0xff] }
  0x4f   :  { %1132 = vmatprep.subr.bf16.mxu1 %v1264_v5 }
  0x51   :  { %1111 = vmatpush3.bf16.msra.mxu0 %v1265_v6 }
  0x52   :  { %1133 = vmatpush3.bf16.msra.mxu1 %v1266_v7  ;;  %1158 = vmatprep.subr.bf16.mxu0 %v1310_v17 }
  0x53   :  { %1178 = vmatprep.subr.bf16.mxu1 %v1310_v17 }
  0x54   :  { %689 = vmatmul.mubr.bf16.vlgmr.msra.gmra.mrb[4].mxu0 %v53_v14 }
  0x55   :  { %729 = vmatmul.mubr.bf16.vlgmr.msra.gmra.mrb[4].mxu1 %v55_v15  ;;  %1159 = vmatpush3.bf16.msra.mxu0 %v1267_v16 }
  0x56   :  { %1160 = vmatprep.subr.bf16.mxu0 %v1310_v17  ;;  %1174 = vmatprep.mubr.msk.bf16.mxu0 %vm1311_vm0, %v1310_v17 }
  0x57   :  { %1194 = vmatprep.mubr.msk.bf16.mxu1 %vm1311_vm0, %v1310_v17  ;;  %1179 = vmatpush3.bf16.msra.mxu1 %v1275_v25 }
  0x58   :  { %1180 = vmatprep.subr.bf16.mxu1 %v1310_v17 }
  0x59   :  { %1161 = vmatpush3.bf16.msra.mxu0 %v1268_v18 }
  0x5a   :  { %1162 = vmatprep.subr.bf16.mxu0 %v1310_v17 }
  0x5b   :  { %1181 = vmatpush3.bf16.msra.mxu1 %v1276_v26 }
  0x5c   :  { %1182 = vmatprep.subr.bf16.mxu1 %v1310_v17 }
  0x5d   :  { %1163 = vmatpush3.bf16.msra.mxu0 %v1269_v19 }
  0x5e   :  { %1164 = vmatprep.subr.bf16.mxu0 %v1310_v17 }
  0x5f   :  { %1183 = vmatpush3.bf16.msra.mxu1 %v1277_v27 }
  0x60   :  { %1184 = vmatprep.subr.bf16.mxu1 %v1310_v17 }
  0x61   :  { %1165 = vmatpush3.bf16.msra.mxu0 %v1270_v20 }
  0x62   :  { %1166 = vmatprep.subr.bf16.mxu0 %v1310_v17 }
  0x63   :  { %1185 = vmatpush3.bf16.msra.mxu1 %v1278_v28 }
  0x64   :  { %1186 = vmatprep.subr.bf16.mxu1 %v1310_v17 }
  0x65   :  { %1167 = vmatpush3.bf16.msra.mxu0 %v1271_v21 }
  0x66   :  { %1168 = vmatprep.subr.bf16.mxu0 %v1310_v17 }
  0x67   :  { %1187 = vmatpush3.bf16.msra.mxu1 %v1279_v29 }
  0x68   :  { %1188 = vmatprep.subr.bf16.mxu1 %v1310_v17 }
  0x69   :  { %1169 = vmatpush3.bf16.msra.mxu0 %v1272_v22 }
  0x6a   :  { %1170 = vmatprep.subr.bf16.mxu0 %v1310_v17 }
  0x6b   :  { %1189 = vmatpush3.bf16.msra.mxu1 %v1280_v30 }
  0x6c   :  { %1190 = vmatprep.subr.bf16.mxu1 %v1310_v17 }
  0x6d   :  { %1171 = vmatpush3.bf16.msra.mxu0 %v1273_v23 }
  0x6e   :  { %1172 = vmatprep.subr.bf16.mxu0 %v1310_v17 }
  0x6f   :  { %1191 = vmatpush3.bf16.msra.mxu1 %v1281_v58 }
  0x70   :  { %1192 = vmatprep.subr.bf16.mxu1 %v1310_v17 }
  0x71   :  { %1173 = vmatpush3.bf16.msra.mxu0 %v1274_v24 }
  0x73   :  { %1193 = vmatpush3.bf16.msra.mxu1 %v1282_v59 }
 0x107   :  { %v1068_v31 = vpop.f32.mrb[0].mxu0 }
 0x108   :  { %v1090_v32 = vpop.f32.mrb[0].mxu1  ;;  %v1069_v34 = vpop.f32.mrb[1].mxu0 }
 0x109   :  { %v1091_v35 = vpop.f32.mrb[1].mxu1  ;;  %v1070_v36 = vadd.f32 %v1069_v34, %v1068_v31  ;;  %v1071_v38 = vpop.f32.mrb[2].mxu0 }
 0x10a   :  { %v1092_v37 = vadd.f32 %v1091_v35, %v1090_v32  ;;  %v1093_v39 = vpop.f32.mrb[2].mxu1  ;;  %v1072_v40 = vpop.f32.mrb[3].mxu0 }
 0x10b   :  { %v1094_v41 = vpop.f32.mrb[3].mxu1  ;;  %v611_v42 = vadd.f32 %v1070_v36, %v969_v33 }
 0x10d   :  { %v651_v43 = vadd.f32 %v1092_v37, %v611_v42 }
 0x127   :  { %v1112_v44 = vpop.f32.mrb[4].mxu0 }
 0x128   :  { %v1134_v45 = vpop.f32.mrb[4].mxu1  ;;  %v1113_v46 = vpop.f32.mrb[5].mxu0 }
 0x129   :  { %v1114_v47 = vadd.f32 %v1113_v46, %v1112_v44  ;;  %v1135_v48 = vpop.f32.mrb[5].mxu1  ;;  %v1115_v49 = vpop.f32.mrb[6].mxu0 }
 0x12a   :  { %v1136_v50 = vadd.f32 %v1135_v48, %v1134_v45  ;;  %v1137_v51 = vpop.f32.mrb[6].mxu1  ;;  %v1116_v52 = vpop.f32.mrb[7].mxu0 }
 0x12b   :  { %v691_v53 = vadd.f32 %v1114_v47, %v651_v43  ;;  %v1138_v54 = vpop.f32.mrb[7].mxu1 }
 0x12d   :  { %v731_v55 = vadd.f32 %v1136_v50, %v691_v53 }
 0x12f   :  { %v736_v56 = vmax.f32 %v731_v55, 0.0 }
 0x131   :  { %v737_v57 = vpack.c.bf16 %v736_v56, %v736_v56 }
 0x133   :  { %1175 = vmatmul.mubr.bf16.vlgmr.msra.gmra.mrb[8].mxu0 %v737_v57 }
 0x206   :  { %v843_v61 = vpop.f32.mrb[8].mxu0 }
 0x207   :  { %v844_v62 = vadd.f32 %v1034_v60, %v843_v61  ;;  %v1176_v63 = vpop.f32.mrb[9].mxu0 }
 0x208   :  { %v846_v0 = vpop.f32.mrb[10].mxu0 }
 0x209   :  { %v849_v1 = vmax.f32 %v844_v62, 0.0  ;;  %v1177_v2 = vpop.f32.mrb[11].mxu0 }
 0x20b   :  { %v850_v3 = vpack.c.bf16 %v849_v1, %v849_v1 }
 0x20d   :  { %1195 = vmatmul.mubr.bf16.vlgmr.msra.gmra.mrb[8].mxu1 %v850_v3 }
 0x2e0   :  { %v956_v5 = vpop.f32.mrb[8].mxu1 }
 0x2e1   :  { %v957_v6 = vadd.f32 %v1043_v4, %v956_v5  ;;  %v1196_v7 = vpop.f32.mrb[9].mxu1 }
 0x2e2   :  { %v959_v8 = vpop.f32.mrb[10].mxu1 }
 0x2e3   :  { %v962_v9 = vpack.c.bf16 %v957_v6, %v957_v6  ;;  %v1197_v10 = vpop.f32.mrb[11].mxu1 }
 0x2e5   :  { %963 = vst [vmem:[%s1473_s7] sm:$0xf] %v962_v9 }
 0x2e6   :  { %968 = vsyncpa [#allocation3], 1 }

</bundles_post_ra>
